<compile_context>
chip_gen: v7x
topology: tpu7x:2x2x1
jax: 0.10.0
libtpu: 0.0.40
codegen_flags: <defaults>
</compile_context>

<pallas_src>
import functools

import jax
import jax.numpy as jnp
from jax.experimental import pallas as pl
from jax.experimental.pallas import tpu as pltpu


def _round_up(x, m):
    return ((x + m - 1) // m) * m


# ----------------------------------------------------------------------------
# Pallas kernel: fused residual-MLP forward for one batch tile.
# All weights live fully in VMEM (single-buffered); only batch is tiled by grid.
# ----------------------------------------------------------------------------
def resnet_mlp_kernel(
    x_ref,        # (TB, D_in)
    w0_ref,       # (D_in, Wp)
    b0_ref,       # (1, Wp)
    wra_ref,      # (L, Wp, Wp)   first linear of each residual block
    bra_ref,      # (L, 1, Wp)
    wrb_ref,      # (L, Wp, Wp)   second linear of each residual block
    brb_ref,      # (L, 1, Wp)
    wout_ref,     # (1, Wp)       output head weight, stored as a row
    bout_ref,     # (1, 1)
    o_ref,        # (1, TB)       lane-dense output (batch on lanes)
):
    x = x_ref[...]

    # base: Linear + ReLU
    h = jnp.dot(x, w0_ref[...], preferred_element_type=jnp.float32) + b0_ref[...]
    h = jnp.maximum(h, 0.0)

    num_layers = wra_ref.shape[0]

    def res_block(h, wa, ba, wb, bb):
        t = jnp.dot(h, wa, preferred_element_type=jnp.float32) + ba
        t = jnp.maximum(t, 0.0)
        # Dropout(p) in eval mode == identity.
        t = jnp.dot(t, wb, preferred_element_type=jnp.float32) + bb
        return h + t

    if num_layers <= 8:
        # Small L: static unroll gives the LLO scheduler full visibility.
        for i in range(num_layers):
            h = res_block(h, wra_ref[i], bra_ref[i], wrb_ref[i], brb_ref[i])
    else:
        # Deep configs: bound live ranges with a loop over the layer index.
        def body(i, h):
            return res_block(h, wra_ref[i], bra_ref[i], wrb_ref[i], brb_ref[i])
        h = jax.lax.fori_loop(0, num_layers, body, h)

    # Output head Linear(width, 1): contract (1, Wp) against (TB, Wp) on the width
    # axis -> (1, TB) lane-dense row straight off the MXU (idle at this point).
    # Avoids a per-tile sublane->lane relayout and masked 1-lane column stores.
    out = jax.lax.dot_general(
        wout_ref[...], h,
        dimension_numbers=(((1,), (1,)), ((), ())),
        preferred_element_type=jnp.float32,
    )  # (1, TB)
    o_ref[...] = (out + bout_ref[...]).astype(o_ref.dtype)


def _choose_tiles(batch, batch_tile):
    """128-aligned batch tiling; >=2 tiles when there is enough work (v7x 2 TCs)."""
    padded0 = _round_up(batch, 128)
    tb_cap = max(128, (batch_tile // 128) * 128)
    if padded0 <= 128:
        tb = 128                                  # tiny batch: one 128-row tile
    else:
        half = _round_up(padded0 // 2, 128)       # aim for >= 2 tiles
        tb = min(tb_cap, half)
    num_tiles = pl.cdiv(padded0, tb)
    padded = num_tiles * tb
    return tb, num_tiles, padded


def resnet_forward(x, params, *, batch_tile=2048):
    """x: (B, H, W_spatial) float32 -> (B,) float32 (flattened logits)."""
    w0, b0, wra, bra, wrb, brb, wout, bout = params
    d_in, width = w0.shape
    n_layers = wra.shape[0]

    # ---- pad width to a lane multiple (zeros are exact: padded columns stay 0
    # through ReLU / residual adds and have zero output-head weight). ----------
    wp = _round_up(width, 128)
    pw = wp - width
    if pw:
        w0 = jnp.pad(w0, ((0, 0), (0, pw)))
        b0 = jnp.pad(b0, ((0, 0), (0, pw)))
        wra = jnp.pad(wra, ((0, 0), (0, pw), (0, pw)))
        bra = jnp.pad(bra, ((0, 0), (0, 0), (0, pw)))
        wrb = jnp.pad(wrb, ((0, 0), (0, pw), (0, pw)))
        brb = jnp.pad(brb, ((0, 0), (0, 0), (0, pw)))
        wout_row = jnp.pad(wout.reshape(1, width), ((0, 0), (0, pw)))
    else:
        wout_row = wout.reshape(1, width)

    x2d = x.reshape((-1, d_in)).astype(jnp.float32)
    batch = x2d.shape[0]

    # ---- VMEM-aware cap on the batch tile: the (tb, d_in) input block is lane-
    # padded to 128 in VMEM and double-buffered; activation temporaries are
    # (tb, wp) f32.  Keep the tb-dependent footprint under ~24 MiB so it fits
    # v7x's 64 MiB VMEM comfortably (v5e/v6e have 128 MiB). ---------------------
    per_row_bytes = 4 * (2 * _round_up(d_in, 128) + 8 * wp)
    tb_vmem_cap = max(128, ((24 * 1024 * 1024) // per_row_bytes // 128) * 128)
    tb, num_tiles, padded = _choose_tiles(batch, min(batch_tile, tb_vmem_cap))

    if padded != batch:
        x2d = jnp.pad(x2d, ((0, padded - batch), (0, 0)))

    # Constant (grid-invariant) operands: single pipeline buffer.
    def const_spec(shape):
        ndim = len(shape)
        return pl.BlockSpec(shape, lambda i: (0,) * ndim,
                            pipeline_mode=pl.Buffered(1))

    weight_bytes = 4 * (d_in * wp + wp + 2 * n_layers * (wp * wp + wp) + wp + 1)
    vmem_budget = (
        2 * tb * _round_up(d_in, 128) * 4   # double-buffered input tile (lane-padded)
        + 2 * 8 * tb * 4                    # double-buffered (1, tb) output row
        + weight_bytes                      # single-buffered weights/biases
        + 8 * tb * wp * 4                   # activation temporaries (h, t, dot results)
    )
    vmem_limit = int(min(48 * 1024 * 1024, max(32 * 1024 * 1024, 2 * vmem_budget)))

    flops = 2 * padded * (d_in * wp + 2 * n_layers * wp * wp + wp)
    bytes_accessed = 4 * padded * (d_in + 1) + weight_bytes

    out_row = pl.pallas_call(
        resnet_mlp_kernel,
        out_shape=jax.ShapeDtypeStruct((1, padded), jnp.float32),
        grid_spec=pltpu.PrefetchScalarGridSpec(
            num_scalar_prefetch=0,
            grid=(num_tiles,),
            in_specs=[
                pl.BlockSpec((tb, d_in), lambda i: (i, 0)),
                const_spec((d_in, wp)),
                const_spec((1, wp)),
                const_spec((n_layers, wp, wp)),
                const_spec((n_layers, 1, wp)),
                const_spec((n_layers, wp, wp)),
                const_spec((n_layers, 1, wp)),
                const_spec((1, wp)),
                const_spec((1, 1)),
            ],
            out_specs=pl.BlockSpec((1, tb), lambda i: (0, i)),
        ),
        compiler_params=pltpu.CompilerParams(
            dimension_semantics=("parallel",),
            vmem_limit_bytes=vmem_limit,
        ),
        cost_estimate=pl.CostEstimate(
            flops=int(flops), transcendentals=0, bytes_accessed=int(bytes_accessed)
        ),
    )(x2d, w0, b0, wra, bra, wrb, brb, wout_row, bout)

    # torch.flatten(output(x)) -> (B,)
    return out_row.reshape(-1)[:batch]


# ----------------------------------------------------------------------------
# Pure-JAX reference (mirrors the PyTorch forward, eval mode)
# ----------------------------------------------------------------------------
def resnet_forward_ref(x, params):
    w0, b0, wra, bra, wrb, brb, wout, bout = params
    d_in = w0.shape[0]
    h = x.reshape((-1, d_in)).astype(jnp.float32)
    h = jnp.maximum(h @ w0 + b0, 0.0)
    for i in range(wra.shape[0]):
        t = jnp.maximum(h @ wra[i] + bra[i], 0.0)
        t = t @ wrb[i] + brb[i]
        h = h + t
    out = jnp.sum(h * wout.reshape(1, -1), axis=-1) + bout[0, 0]
    return out


# ----------------------------------------------------------------------------
# Deterministic parameter construction (synthetic; shapes from __init__)
# ----------------------------------------------------------------------------
def make_params(key, input_size, width, layer_number):
    ks = jax.random.split(key, 8)
    scale0 = 1.0 / jnp.sqrt(input_size)
    scale_w = 1.0 / jnp.sqrt(width)
    w0 = jax.random.uniform(ks[0], (input_size, width), jnp.float32, -scale0, scale0)
    b0 = jax.random.uniform(ks[1], (1, width), jnp.float32, -scale0, scale0)
    wra = jax.random.uniform(ks[2], (layer_number, width, width), jnp.float32, -scale_w, scale_w)
    bra = jax.random.uniform(ks[3], (layer_number, 1, width), jnp.float32, -scale_w, scale_w)
    wrb = jax.random.uniform(ks[4], (layer_number, width, width), jnp.float32, -scale_w, scale_w)
    brb = jax.random.uniform(ks[5], (layer_number, 1, width), jnp.float32, -scale_w, scale_w)
    wout = jax.random.uniform(ks[6], (width, 1), jnp.float32, -scale_w, scale_w)
    bout = jax.random.uniform(ks[7], (1, 1), jnp.float32, -scale_w, scale_w)
    return (w0, b0, wra, bra, wrb, brb, wout, bout)


if __name__ == "__main__":
    # Shapes consistent with the module:
    #   input_shape = (4, 4) -> input_size = 16
    #   layer_number = 2, width = 32, activation = ReLU, dropout_rate = 0.1 (eval)
    input_shape = (4, 4)
    layer_number = 2
    width = 32

    key = jax.random.PRNGKey(0)
    kx1, kx2, kp = jax.random.split(key, 3)
    params = make_params(kp, input_shape[0] * input_shape[1], width, layer_number)

    # Case 1: small batch -> single 128-row (padded) lane-aligned tile.
    batch = 16
    x = jax.random.normal(kx1, (batch,) + input_shape, jnp.float32)
    fwd = jax.jit(functools.partial(resnet_forward, batch_tile=2048))
    out = jax.block_until_ready(fwd(x, params))
    ref = resnet_forward_ref(x, params)
    assert out.shape == (batch,), out.shape
    assert jnp.allclose(out, ref, atol=1e-4, rtol=1e-4), (out, ref)

    # Case 2: larger batch -> multi-tile (>=2 grid steps), 128-aligned, padded.
    batch2 = 200
    x2 = jax.random.normal(kx2, (batch2,) + input_shape, jnp.float32)
    fwd2 = jax.jit(functools.partial(resnet_forward, batch_tile=128))
    out2 = jax.block_until_ready(fwd2(x2, params))
    ref2 = resnet_forward_ref(x2, params)
    assert out2.shape == (batch2,), out2.shape
    assert jnp.allclose(out2, ref2, atol=1e-4, rtol=1e-4), (out2, ref2)

    print("KERNEL_OK")
</pallas_src>

<mosaic_0001>
module attributes {stable_mosaic.version = 11 : i64} {
  func.func @resnet_mlp_kernel(%arg0: i32, %arg1: memref<128x16xf32, #tpu.memory_space<vmem>>, %arg2: memref<16x128xf32, #tpu.memory_space<vmem>>, %arg3: memref<1x128xf32, #tpu.memory_space<vmem>>, %arg4: memref<2x128x128xf32, #tpu.memory_space<vmem>>, %arg5: memref<2x1x128xf32, #tpu.memory_space<vmem>>, %arg6: memref<2x128x128xf32, #tpu.memory_space<vmem>>, %arg7: memref<2x1x128xf32, #tpu.memory_space<vmem>>, %arg8: memref<1x128xf32, #tpu.memory_space<vmem>>, %arg9: memref<1x1xf32, #tpu.memory_space<vmem>>, %arg10: memref<1x128xf32, #tpu.memory_space<vmem>>) attributes {dimension_semantics = [#tpu.dimension_semantics<parallel>], iteration_bounds = array<i64: 1>, scalar_prefetch = 0 : i64, scratch_operands = 0 : i64, tpu.core_type = #tpu.core_type<tc>, window_params = [{transform_indices = @transform_0, window_bounds = array<i64: 128, 16>}, {pipeline_mode = #tpu.pipeline_mode<synchronous>, transform_indices = @transform_1, window_bounds = array<i64: 16, 128>}, {pipeline_mode = #tpu.pipeline_mode<synchronous>, transform_indices = @transform_2, window_bounds = array<i64: 1, 128>}, {pipeline_mode = #tpu.pipeline_mode<synchronous>, transform_indices = @transform_3, window_bounds = array<i64: 2, 128, 128>}, {pipeline_mode = #tpu.pipeline_mode<synchronous>, transform_indices = @transform_4, window_bounds = array<i64: 2, 1, 128>}, {pipeline_mode = #tpu.pipeline_mode<synchronous>, transform_indices = @transform_5, window_bounds = array<i64: 2, 128, 128>}, {pipeline_mode = #tpu.pipeline_mode<synchronous>, transform_indices = @transform_6, window_bounds = array<i64: 2, 1, 128>}, {pipeline_mode = #tpu.pipeline_mode<synchronous>, transform_indices = @transform_7, window_bounds = array<i64: 1, 128>}, {pipeline_mode = #tpu.pipeline_mode<synchronous>, transform_indices = @transform_8, window_bounds = array<i64: 1, 1>}, {transform_indices = @transform_9, window_bounds = array<i64: 1, 128>}]} {
    %c0 = arith.constant 0 : index
    %c0_0 = arith.constant 0 : index
    %0 = vector.load %arg1[%c0, %c0_0] : memref<128x16xf32, #tpu.memory_space<vmem>>, vector<128x16xf32>
    %c0_1 = arith.constant 0 : index
    %c0_2 = arith.constant 0 : index
    %1 = vector.load %arg2[%c0_1, %c0_2] : memref<16x128xf32, #tpu.memory_space<vmem>>, vector<16x128xf32>
    %cst = arith.constant dense<0.000000e+00> : vector<128x128xf32>
    %2 = tpu.matmul %0, %1, %cst {dimension_numbers = #tpu.dot_dimension_numbers<[1], [0], [0], [1], [0, 0, 1, 1], [], []>} : vector<128x16xf32>, vector<16x128xf32>, vector<128x128xf32> -> vector<128x128xf32>
    %c0_3 = arith.constant 0 : index
    %c0_4 = arith.constant 0 : index
    %3 = vector.load %arg3[%c0_3, %c0_4] : memref<1x128xf32, #tpu.memory_space<vmem>>, vector<1x128xf32>
    %4 = vector.broadcast %3 : vector<1x128xf32> to vector<128x128xf32>
    %5 = arith.addf %2, %4 : vector<128x128xf32>
    %cst_5 = arith.constant 0.000000e+00 : f32
    %6 = vector.broadcast %cst_5 : f32 to vector<128x128xf32>
    %7 = arith.maximumf %5, %6 : vector<128x128xf32>
    %c0_6 = arith.constant 0 : index
    %c0_7 = arith.constant 0 : index
    %c0_8 = arith.constant 0 : index
    %8 = vector.load %arg4[%c0_6, %c0_7, %c0_8] : memref<2x128x128xf32, #tpu.memory_space<vmem>>, vector<1x128x128xf32>
    %9 = vector.shape_cast %8 : vector<1x128x128xf32> to vector<128x128xf32>
    %c0_9 = arith.constant 0 : index
    %c0_10 = arith.constant 0 : index
    %c0_11 = arith.constant 0 : index
    %10 = vector.load %arg5[%c0_9, %c0_10, %c0_11] : memref<2x1x128xf32, #tpu.memory_space<vmem>>, vector<1x1x128xf32>
    %11 = vector.shape_cast %10 : vector<1x1x128xf32> to vector<1x128xf32>
    %c0_12 = arith.constant 0 : index
    %c0_13 = arith.constant 0 : index
    %c0_14 = arith.constant 0 : index
    %12 = vector.load %arg6[%c0_12, %c0_13, %c0_14] : memref<2x128x128xf32, #tpu.memory_space<vmem>>, vector<1x128x128xf32>
    %13 = vector.shape_cast %12 : vector<1x128x128xf32> to vector<128x128xf32>
    %c0_15 = arith.constant 0 : index
    %c0_16 = arith.constant 0 : index
    %c0_17 = arith.constant 0 : index
    %14 = vector.load %arg7[%c0_15, %c0_16, %c0_17] : memref<2x1x128xf32, #tpu.memory_space<vmem>>, vector<1x1x128xf32>
    %15 = vector.shape_cast %14 : vector<1x1x128xf32> to vector<1x128xf32>
    %cst_18 = arith.constant dense<0.000000e+00> : vector<128x128xf32>
    %16 = tpu.matmul %7, %9, %cst_18 {dimension_numbers = #tpu.dot_dimension_numbers<[1], [0], [0], [1], [0, 0, 1, 1], [], []>} : vector<128x128xf32>, vector<128x128xf32>, vector<128x128xf32> -> vector<128x128xf32>
    %17 = vector.broadcast %11 : vector<1x128xf32> to vector<128x128xf32>
    %18 = arith.addf %16, %17 : vector<128x128xf32>
    %cst_19 = arith.constant 0.000000e+00 : f32
    %19 = vector.broadcast %cst_19 : f32 to vector<128x128xf32>
    %20 = arith.maximumf %18, %19 : vector<128x128xf32>
    %cst_20 = arith.constant dense<0.000000e+00> : vector<128x128xf32>
    %21 = tpu.matmul %20, %13, %cst_20 {dimension_numbers = #tpu.dot_dimension_numbers<[1], [0], [0], [1], [0, 0, 1, 1], [], []>} : vector<128x128xf32>, vector<128x128xf32>, vector<128x128xf32> -> vector<128x128xf32>
    %22 = vector.broadcast %15 : vector<1x128xf32> to vector<128x128xf32>
    %23 = arith.addf %21, %22 : vector<128x128xf32>
    %24 = arith.addf %7, %23 : vector<128x128xf32>
    %c1 = arith.constant 1 : index
    %c0_21 = arith.constant 0 : index
    %c0_22 = arith.constant 0 : index
    %25 = vector.load %arg4[%c1, %c0_21, %c0_22] : memref<2x128x128xf32, #tpu.memory_space<vmem>>, vector<1x128x128xf32>
    %26 = vector.shape_cast %25 : vector<1x128x128xf32> to vector<128x128xf32>
    %c1_23 = arith.constant 1 : index
    %c0_24 = arith.constant 0 : index
    %c0_25 = arith.constant 0 : index
    %27 = vector.load %arg5[%c1_23, %c0_24, %c0_25] : memref<2x1x128xf32, #tpu.memory_space<vmem>>, vector<1x1x128xf32>
    %28 = vector.shape_cast %27 : vector<1x1x128xf32> to vector<1x128xf32>
    %c1_26 = arith.constant 1 : index
    %c0_27 = arith.constant 0 : index
    %c0_28 = arith.constant 0 : index
    %29 = vector.load %arg6[%c1_26, %c0_27, %c0_28] : memref<2x128x128xf32, #tpu.memory_space<vmem>>, vector<1x128x128xf32>
    %30 = vector.shape_cast %29 : vector<1x128x128xf32> to vector<128x128xf32>
    %c1_29 = arith.constant 1 : index
    %c0_30 = arith.constant 0 : index
    %c0_31 = arith.constant 0 : index
    %31 = vector.load %arg7[%c1_29, %c0_30, %c0_31] : memref<2x1x128xf32, #tpu.memory_space<vmem>>, vector<1x1x128xf32>
    %32 = vector.shape_cast %31 : vector<1x1x128xf32> to vector<1x128xf32>
    %cst_32 = arith.constant dense<0.000000e+00> : vector<128x128xf32>
    %33 = tpu.matmul %24, %26, %cst_32 {dimension_numbers = #tpu.dot_dimension_numbers<[1], [0], [0], [1], [0, 0, 1, 1], [], []>} : vector<128x128xf32>, vector<128x128xf32>, vector<128x128xf32> -> vector<128x128xf32>
    %34 = vector.broadcast %28 : vector<1x128xf32> to vector<128x128xf32>
    %35 = arith.addf %33, %34 : vector<128x128xf32>
    %cst_33 = arith.constant 0.000000e+00 : f32
    %36 = vector.broadcast %cst_33 : f32 to vector<128x128xf32>
    %37 = arith.maximumf %35, %36 : vector<128x128xf32>
    %cst_34 = arith.constant dense<0.000000e+00> : vector<128x128xf32>
    %38 = tpu.matmul %37, %30, %cst_34 {dimension_numbers = #tpu.dot_dimension_numbers<[1], [0], [0], [1], [0, 0, 1, 1], [], []>} : vector<128x128xf32>, vector<128x128xf32>, vector<128x128xf32> -> vector<128x128xf32>
    %39 = vector.broadcast %32 : vector<1x128xf32> to vector<128x128xf32>
    %40 = arith.addf %38, %39 : vector<128x128xf32>
    %41 = arith.addf %24, %40 : vector<128x128xf32>
    %c0_35 = arith.constant 0 : index
    %c0_36 = arith.constant 0 : index
    %42 = vector.load %arg8[%c0_35, %c0_36] : memref<1x128xf32, #tpu.memory_space<vmem>>, vector<1x128xf32>
    %cst_37 = arith.constant dense<0.000000e+00> : vector<1x128xf32>
    %43 = tpu.matmul %42, %41, %cst_37 {dimension_numbers = #tpu.dot_dimension_numbers<[1], [1], [0], [0], [0, 0, 1, 0], [], []>} : vector<1x128xf32>, vector<128x128xf32>, vector<1x128xf32> -> vector<1x128xf32>
    %c0_38 = arith.constant 0 : index
    %c0_39 = arith.constant 0 : index
    %44 = vector.load %arg9[%c0_38, %c0_39] : memref<1x1xf32, #tpu.memory_space<vmem>>, vector<1x1xf32>
    %45 = vector.broadcast %44 : vector<1x1xf32> to vector<1x128xf32>
    %46 = arith.addf %43, %45 : vector<1x128xf32>
    %c0_40 = arith.constant 0 : index
    %c0_41 = arith.constant 0 : index
    %47 = vector.load %arg10[%c0_40, %c0_41] : memref<1x128xf32, #tpu.memory_space<vmem>>, vector<1x128xf32>
    tpu.vector_store %arg10[%c0_40, %c0_41], %46 {strides = array<i32>} : memref<1x128xf32, #tpu.memory_space<vmem>>, vector<1x128xf32>,
    return
  }
  func.func @transform_0(%arg0: i32) -> (i32, i32) {
    %c0_i32 = arith.constant 0 : i32
    %c0_i32_0 = arith.constant 0 : i32
    return %arg0, %c0_i32 : i32, i32
  }
  func.func @transform_1(%arg0: i32) -> (i32, i32) {
    %c0_i32 = arith.constant 0 : i32
    %c0_i32_0 = arith.constant 0 : i32
    %c0_i32_1 = arith.constant 0 : i32
    return %c0_i32, %c0_i32_0 : i32, i32
  }
  func.func @transform_2(%arg0: i32) -> (i32, i32) {
    %c0_i32 = arith.constant 0 : i32
    %c0_i32_0 = arith.constant 0 : i32
    %c0_i32_1 = arith.constant 0 : i32
    return %c0_i32, %c0_i32_0 : i32, i32
  }
  func.func @transform_3(%arg0: i32) -> (i32, i32, i32) {
    %c0_i32 = arith.constant 0 : i32
    %c0_i32_0 = arith.constant 0 : i32
    %c0_i32_1 = arith.constant 0 : i32
    %c0_i32_2 = arith.constant 0 : i32
    return %c0_i32, %c0_i32_0, %c0_i32_1 : i32, i32, i32
  }
  func.func @transform_4(%arg0: i32) -> (i32, i32, i32) {
    %c0_i32 = arith.constant 0 : i32
    %c0_i32_0 = arith.constant 0 : i32
    %c0_i32_1 = arith.constant 0 : i32
    %c0_i32_2 = arith.constant 0 : i32
    return %c0_i32, %c0_i32_0, %c0_i32_1 : i32, i32, i32
  }
  func.func @transform_5(%arg0: i32) -> (i32, i32, i32) {
    %c0_i32 = arith.constant 0 : i32
    %c0_i32_0 = arith.constant 0 : i32
    %c0_i32_1 = arith.constant 0 : i32
    %c0_i32_2 = arith.constant 0 : i32
    return %c0_i32, %c0_i32_0, %c0_i32_1 : i32, i32, i32
  }
  func.func @transform_6(%arg0: i32) -> (i32, i32, i32) {
    %c0_i32 = arith.constant 0 : i32
    %c0_i32_0 = arith.constant 0 : i32
    %c0_i32_1 = arith.constant 0 : i32
    %c0_i32_2 = arith.constant 0 : i32
    return %c0_i32, %c0_i32_0, %c0_i32_1 : i32, i32, i32
  }
  func.func @transform_7(%arg0: i32) -> (i32, i32) {
    %c0_i32 = arith.constant 0 : i32
    %c0_i32_0 = arith.constant 0 : i32
    %c0_i32_1 = arith.constant 0 : i32
    return %c0_i32, %c0_i32_0 : i32, i32
  }
  func.func @transform_8(%arg0: i32) -> (i32, i32) {
    %c0_i32 = arith.constant 0 : i32
    %c0_i32_0 = arith.constant 0 : i32
    %c0_i32_1 = arith.constant 0 : i32
    return %c0_i32, %c0_i32_0 : i32, i32
  }
  func.func @transform_9(%arg0: i32) -> (i32, i32) {
    %c0_i32 = arith.constant 0 : i32
    %c0_i32_0 = arith.constant 0 : i32
    return %c0_i32, %arg0 : i32, i32
  }
}

</mosaic_0001>

<bundles_post_ra>
// kernel: resnet_forward.1
= control target key start
LH: loop header
LB: loop body
LE: loop exit
PB: predicated region body
PF: predicated region fallthrough
CT: control target
= control target key end

     0   :  { %vm59_vm0 = vcmask 130048   ;;  %vm1762_vm1 = vmmov 0   ;;  %s2285_s1 = inlined_call_operand.vmem [shape: f32[16,128], index: 1, kind: input, shape index: {}]   ;;  %s2286_s0 = inlined_call_operand.vmem [shape: f32[128,16], index: 0, kind: input, shape index: {}]   ;;  %s2287_s3 = inlined_call_operand.vmem [shape: f32[2,128,128], index: 3, kind: input, shape index: {}]   ;;  %s2288_s5 = inlined_call_operand.vmem [shape: f32[2,128,128], index: 5, kind: input, shape index: {}]   ;;  %s2289_s2 = inlined_call_operand.vmem [shape: f32[1,128], index: 2, kind: input, shape index: {}]   ;;  %s2290_s4 = inlined_call_operand.vmem [shape: f32[2,1,128], index: 4, kind: input, shape index: {}]   ;;  %s2291_s6 = inlined_call_operand.vmem [shape: f32[2,1,128], index: 6, kind: input, shape index: {}]   ;;  %s2292_s8 = inlined_call_operand.<no memory space> [shape: f32[1,1], index: 8, kind: input, shape index: {}]   ;;  %s2293_s7 = inlined_call_operand.vmem [shape: f32[1,128], index: 7, kind: input, shape index: {}]   ;;  %s2294_s9 = inlined_call_operand.vmem [shape: f32[1,128], index: 9, kind: output, shape index: {}]  }
   0x1   :  { %v50_v0 = vld [vmem:[%s2285_s1] sm:$0xff]  ;;  %v51_v1 = vld [vmem:[%s2285_s1 + $0x8] sm:$0xff]  ;;  %v36_v5 = vld [vmem:[%s2286_s0 + $0x10] sm:$0xff] }
   0x2   :  { %v34_v2 = vld [vmem:[%s2286_s0] sm:$0xff]  ;;  %v1600_v3 = vpack.c.bf16 %v51_v1, %v50_v0  ;;  %v35_v4 = vld [vmem:[%s2286_s0 + $0x8] sm:$0xff]  ;;  %v271_v8 = vld [vmem:[%s2287_s3 + $0x10] sm:$0xff] }
   0x3   :  { %1317 = vmatprep.mubr.msk.f32.mxu0 %vm59_vm0, %v34_v2  ;;  %v269_v6 = vld [vmem:[%s2287_s3] sm:$0xff]  ;;  %v270_v7 = vld [vmem:[%s2287_s3 + $0x8] sm:$0xff]  ;;  %v272_v10 = vld [vmem:[%s2287_s3 + $0x18] sm:$0xff] }
   0x4   :  { %1601 = vmatprep.subr.bf16.mxu0 %v1600_v3  ;;  %v1604_v9 = vpack.c.bf16 %v270_v7, %v269_v6  ;;  %v37_v11 = vld [vmem:[%s2286_s0 + $0x18] sm:$0xff]  ;;  %v1608_v12 = vpack.c.bf16 %v272_v10, %v271_v8  ;;  %v273_v13 = vld [vmem:[%s2287_s3 + $0x20] sm:$0xff]  ;;  %v274_v14 = vld [vmem:[%s2287_s3 + $0x28] sm:$0xff] }
   0x5   :  { %1603 = vmatpush3.bf16.msra.mxu0 %v1600_v3  ;;  %v38_v15 = vld [vmem:[%s2286_s0 + $0x20] sm:$0xff]  ;;  %v1612_v16 = vpack.c.bf16 %v274_v14, %v273_v13  ;;  %v39_v17 = vld [vmem:[%s2286_s0 + $0x28] sm:$0xff]  ;;  %v275_v18 = vld [vmem:[%s2287_s3 + $0x30] sm:$0xff] }
   0x6   :  { %1605 = vmatprep.subr.bf16.mxu1 %v1604_v9  ;;  %v276_v19 = vld [vmem:[%s2287_s3 + $0x38] sm:$0xff]  ;;  %v40_v20 = vld [vmem:[%s2286_s0 + $0x30] sm:$0xff]  ;;  %v277_v23 = vld [vmem:[%s2287_s3 + $0x40] sm:$0xff] }
   0x7   :  { %1607 = vmatpush3.bf16.msra.mxu1 %v1604_v9  ;;  %v1616_v21 = vpack.c.bf16 %v276_v19, %v275_v18  ;;  %v41_v22 = vld [vmem:[%s2286_s0 + $0x38] sm:$0xff]  ;;  %v278_v24 = vld [vmem:[%s2287_s3 + $0x48] sm:$0xff]  ;;  %v42_v25 = vld [vmem:[%s2286_s0 + $0x40] sm:$0xff] }
   0x8   :  { %1318 = vmatmul.mubr.msk.f32.vlgmr.msra.gmra.mrb[0].mxu0 %vm59_vm0, %v35_v4  ;;  %1609 = vmatprep.subr.bf16.mxu1 %v1608_v12  ;;  %v1620_v26 = vpack.c.bf16 %v278_v24, %v277_v23  ;;  %v43_v27 = vld [vmem:[%s2286_s0 + $0x48] sm:$0xff]  ;;  %v279_v28 = vld [vmem:[%s2287_s3 + $0x50] sm:$0xff]  ;;  %v280_v29 = vld [vmem:[%s2287_s3 + $0x58] sm:$0xff] }
   0x9   :  { %1320 = vmatprep.mubr.msk.f32.mxu0 %vm59_vm0, %v36_v5  ;;  %v44_v30 = vld [vmem:[%s2286_s0 + $0x50] sm:$0xff]  ;;  %v1624_v31 = vpack.c.bf16 %v280_v29, %v279_v28  ;;  %v45_v32 = vld [vmem:[%s2286_s0 + $0x58] sm:$0xff]  ;;  %v281_v33 = vld [vmem:[%s2287_s3 + $0x60] sm:$0xff] }
   0xa   :  { %v282_v34 = vld [vmem:[%s2287_s3 + $0x68] sm:$0xff]  ;;  %v46_v35 = vld [vmem:[%s2286_s0 + $0x60] sm:$0xff]  ;;  %v48_v38 = vld [vmem:[%s2286_s0 + $0x70] sm:$0xff] }
   0xb   :  { %1611 = vmatpush3.bf16.msra.mxu1 %v1608_v12  ;;  %v1628_v36 = vpack.c.bf16 %v282_v34, %v281_v33  ;;  %v47_v37 = vld [vmem:[%s2286_s0 + $0x68] sm:$0xff]  ;;  %v49_v39 = vld [vmem:[%s2286_s0 + $0x78] sm:$0xff]  ;;  %v283_v40 = vld [vmem:[%s2287_s3 + $0x70] sm:$0xff] }
   0xc   :  { %1321 = vmatmul.mubr.msk.f32.gmra.mrb[2].mxu0 %vm59_vm0, %v37_v11  ;;  %1613 = vmatprep.subr.bf16.mxu1 %v1612_v16  ;;  %v284_v41 = vld [vmem:[%s2287_s3 + $0x78] sm:$0xff]  ;;  %v286_v43 = vld [vmem:[%s2288_s5] sm:$0xff]  ;;  %v287_v44 = vld [vmem:[%s2288_s5 + $0x8] sm:$0xff] }
   0xd   :  { %1323 = vmatprep.mubr.msk.f32.mxu0 %vm59_vm0, %v38_v15  ;;  %v1632_v42 = vpack.c.bf16 %v284_v41, %v283_v40  ;;  %v288_v45 = vld [vmem:[%s2288_s5 + $0x10] sm:$0xff]  ;;  %v1636_v46 = vpack.c.bf16 %v287_v44, %v286_v43  ;;  %v289_v47 = vld [vmem:[%s2288_s5 + $0x18] sm:$0xff]  ;;  %v290_v49 = vld [vmem:[%s2288_s5 + $0x20] sm:$0xff] }
   0xe   :  { %v1640_v48 = vpack.c.bf16 %v289_v47, %v288_v45  ;;  %v291_v50 = vld [vmem:[%s2288_s5 + $0x28] sm:$0xff]  ;;  %v292_v52 = vld [vmem:[%s2288_s5 + $0x30] sm:$0xff]  ;;  %v293_v53 = vld [vmem:[%s2288_s5 + $0x38] sm:$0xff] }
   0xf   :  { %1615 = vmatpush3.bf16.msra.mxu1 %v1612_v16  ;;  %1637 = vmatprep.subr.bf16.mxu0 %v1636_v46  ;;  %v1644_v51 = vpack.c.bf16 %v291_v50, %v290_v49  ;;  %v1648_v54 = vpack.c.bf16 %v293_v53, %v292_v52  ;;  %v294_v55 = vld [vmem:[%s2288_s5 + $0x40] sm:$0xff]  ;;  %v295_v56 = vld [vmem:[%s2288_s5 + $0x48] sm:$0xff]  ;;  %v296_v58 = vld [vmem:[%s2288_s5 + $0x50] sm:$0xff] }
  0x10   :  { %1324 = vmatmul.mubr.msk.f32.gmra.mrb[4].mxu0 %vm59_vm0, %v39_v17  ;;  %1617 = vmatprep.subr.bf16.mxu1 %v1616_v21  ;;  %v1652_v57 = vpack.c.bf16 %v295_v56, %v294_v55  ;;  %v297_v59 = vld [vmem:[%s2288_s5 + $0x58] sm:$0xff]  ;;  %v298_v61 = vld [vmem:[%s2288_s5 + $0x60] sm:$0xff]  ;;  %v299_v62 = vld [vmem:[%s2288_s5 + $0x68] sm:$0xff] }
  0x11   :  { %1326 = vmatprep.mubr.msk.f32.mxu0 %vm59_vm0, %v40_v20  ;;  %1639 = vmatpush3.bf16.msra.mxu0 %v1636_v46  ;;  %v1656_v60 = vpack.c.bf16 %v297_v59, %v296_v58  ;;  %v1660_v63 = vpack.c.bf16 %v299_v62, %v298_v61  ;;  %v1095_v0 = vld [vmem:[%s2289_s2] ss:$0 sm:$0xff]  ;;  %v300_v49 = vld [vmem:[%s2288_s5 + $0x70] sm:$0xff]  ;;  %v301_v50 = vld [vmem:[%s2288_s5 + $0x78] sm:$0xff] }
  0x12   :  { %1641 = vmatprep.subr.bf16.mxu0 %v1640_v48  ;;  %v1114_v52 = vld [vmem:[%s2287_s3 + $0x80] sm:$0xff]  ;;  %v1115_v53 = vld [vmem:[%s2287_s3 + $0x88] sm:$0xff]  ;;  %v1117_v56 = vld [vmem:[%s2287_s3 + $0x98] sm:$0xff] }
  0x13   :  { %1619 = vmatpush3.bf16.msra.mxu1 %v1616_v21  ;;  %v1668_v55 = vpack.c.bf16 %v1115_v53, %v1114_v52  ;;  %v1118_v58 = vld [vmem:[%s2287_s3 + $0xa0] sm:$0xff]  ;;  %v1119_v59 = vld [vmem:[%s2287_s3 + $0xa8] sm:$0xff]  ;;  %v1120_v61 = vld [vmem:[%s2287_s3 + $0xb0] sm:$0xff] }
  0x14   :  { %1327 = vmatmul.mubr.msk.f32.gmra.mrb[6].mxu0 %vm59_vm0, %v41_v22  ;;  %1621 = vmatprep.subr.bf16.mxu1 %v1620_v26  ;;  %v1121_v62 = vld [vmem:[%s2287_s3 + $0xb8] sm:$0xff] }
  0x15   :  { %1329 = vmatprep.mubr.msk.f32.mxu0 %vm59_vm0, %v42_v25  ;;  %1643 = vmatpush3.bf16.msra.mxu0 %v1640_v48 }
  0x16   :  { %1645 = vmatprep.subr.bf16.mxu0 %v1644_v51 }
  0x17   :  { %1623 = vmatpush3.bf16.msra.mxu1 %v1620_v26 }
  0x18   :  { %1330 = vmatmul.mubr.msk.f32.gmra.mrb[8].mxu0 %vm59_vm0, %v43_v27  ;;  %1625 = vmatprep.subr.bf16.mxu1 %v1624_v31 }
  0x19   :  { %1332 = vmatprep.mubr.msk.f32.mxu0 %vm59_vm0, %v44_v30  ;;  %1647 = vmatpush3.bf16.msra.mxu0 %v1644_v51  ;;  %v1664_v51 = vpack.c.bf16 %v301_v50, %v300_v49 }
  0x1a   :  { %1649 = vmatprep.subr.bf16.mxu0 %v1648_v54 }
  0x1b   :  { %1627 = vmatpush3.bf16.msra.mxu1 %v1624_v31 }
  0x1c   :  { %1333 = vmatmul.mubr.msk.f32.gmra.mrb[10].mxu0 %vm59_vm0, %v45_v32  ;;  %1629 = vmatprep.subr.bf16.mxu1 %v1628_v36 }
  0x1d   :  { %1335 = vmatprep.mubr.msk.f32.mxu0 %vm59_vm0, %v46_v35  ;;  %1651 = vmatpush3.bf16.msra.mxu0 %v1648_v54  ;;  %v1116_v54 = vld [vmem:[%s2287_s3 + $0x90] sm:$0xff] }
  0x1e   :  { %1653 = vmatprep.subr.bf16.mxu0 %v1652_v57 }
  0x1f   :  { %1631 = vmatpush3.bf16.msra.mxu1 %v1628_v36 }
  0x20   :  { %1336 = vmatmul.mubr.msk.f32.gmra.mrb[12].mxu0 %vm59_vm0, %v47_v37  ;;  %1633 = vmatprep.subr.bf16.mxu1 %v1632_v42 }
  0x21   :  { %1338 = vmatprep.mubr.msk.f32.mxu0 %vm59_vm0, %v48_v38  ;;  %1655 = vmatpush3.bf16.msra.mxu0 %v1652_v57  ;;  %v1672_v57 = vpack.c.bf16 %v1117_v56, %v1116_v54 }
  0x22   :  { %1657 = vmatprep.subr.bf16.mxu0 %v1656_v60 }
  0x23   :  { %1635 = vmatpush3.bf16.msra.mxu1 %v1632_v42 }
  0x24   :  { %1339 = vmatmul.mubr.msk.f32.gmra.mrb[14].mxu0 %vm59_vm0, %v49_v39  ;;  %1669 = vmatprep.subr.bf16.mxu1 %v1668_v55 }
  0x25   :  { %1659 = vmatpush3.bf16.msra.mxu0 %v1656_v60  ;;  %v1676_v60 = vpack.c.bf16 %v1119_v59, %v1118_v58 }
  0x26   :  { %1661 = vmatprep.subr.bf16.mxu0 %v1660_v63 }
  0x29   :  { %1663 = vmatpush3.bf16.msra.mxu0 %v1660_v63  ;;  %v1680_v63 = vpack.c.bf16 %v1121_v62, %v1120_v61 }
  0x2a   :  { %1665 = vmatprep.subr.bf16.mxu0 %v1664_v51 }
  0x2d   :  { %1667 = vmatpush3.bf16.msra.mxu0 %v1664_v51 }
  0xdb   :  { %v1319_v1 = vpop.f32.mrb[0].mxu0 }
  0xdc   :  { %v1978_v2 = vadd.f32 %v1319_v1, %v1095_v0  ;;  %v174_v3 = vpop.f32.mrb[1].mxu0  ;;  %v1123_v1 = vld [vmem:[%s2287_s3 + $0xc8] sm:$0xff] }
  0xdd   :  { %v1980_v4 = vadd.f32 %v1095_v0, %v174_v3 }
  0xde   :  { %v254_v7 = vmax.f32 %v1978_v2, 0.0 }
  0xdf   :  { %v253_v5 = vmax.f32 %v1980_v4, 0.0  ;;  %v1322_v6 = vpop.f32.mrb[2].mxu0 }
  0xe0   :  { %v1984_v8 = vadd.f32 %v1322_v6, %v1095_v0  ;;  %v184_v9 = vpop.f32.mrb[3].mxu0  ;;  %v1124_v6 = vld [vmem:[%s2287_s3 + $0xd0] sm:$0xff] }
  0xe1   :  { %v1986_v10 = vadd.f32 %v1095_v0, %v184_v9  ;;  %1373 = vmatprep.mubr.f32.mxu1 %v253_v5  ;;  %v1125_v9 = vld [vmem:[%s2287_s3 + $0xd8] sm:$0xff] }
  0xe2   :  { %v256_v11 = vmax.f32 %v1984_v8, 0.0  ;;  %1374 = vmatmul.mubr.f32.vlgmr.msra.gmra.mrb[0].mxu1 %v254_v7 }
  0xe3   :  { %v255_v12 = vmax.f32 %v1986_v10, 0.0  ;;  %v1325_v13 = vpop.f32.mrb[4].mxu0  ;;  %1671 = vmatpush3.bf16.msra.mxu1 %v1668_v55 }
  0xe4   :  { %v1994_v14 = vadd.f32 %v1325_v13, %v1095_v0  ;;  %v194_v15 = vpop.f32.mrb[5].mxu0  ;;  %1673 = vmatprep.subr.bf16.mxu1 %v1672_v57  ;;  %v1688_v13 = vpack.c.bf16 %v1125_v9, %v1124_v6 }
  0xe5   :  { %v1996_v16 = vadd.f32 %v1095_v0, %v194_v15  ;;  %1376 = vmatprep.mubr.f32.mxu1 %v255_v12  ;;  %v1126_v15 = vld [vmem:[%s2287_s3 + $0xe0] sm:$0xff] }
  0xe6   :  { %v258_v17 = vmax.f32 %v1994_v14, 0.0  ;;  %1377 = vmatmul.mubr.f32.gmra.mrb[2].mxu1 %v256_v11 }
  0xe7   :  { %v257_v18 = vmax.f32 %v1996_v16, 0.0  ;;  %v1328_v19 = vpop.f32.mrb[6].mxu0  ;;  %1675 = vmatpush3.bf16.msra.mxu1 %v1672_v57 }
  0xe8   :  { %v2004_v20 = vadd.f32 %v1328_v19, %v1095_v0  ;;  %v204_v21 = vpop.f32.mrb[7].mxu0  ;;  %1677 = vmatprep.subr.bf16.mxu1 %v1676_v60  ;;  %v1127_v19 = vld [vmem:[%s2287_s3 + $0xe8] sm:$0xff] }
  0xe9   :  { %v2006_v22 = vadd.f32 %v1095_v0, %v204_v21  ;;  %1379 = vmatprep.mubr.f32.mxu1 %v257_v18  ;;  %v1692_v21 = vpack.c.bf16 %v1127_v19, %v1126_v15 }
  0xea   :  { %v260_v23 = vmax.f32 %v2004_v20, 0.0  ;;  %1380 = vmatmul.mubr.f32.gmra.mrb[4].mxu1 %v258_v17 }
  0xeb   :  { %v259_v24 = vmax.f32 %v2006_v22, 0.0  ;;  %v1331_v25 = vpop.f32.mrb[8].mxu0  ;;  %1679 = vmatpush3.bf16.msra.mxu1 %v1676_v60 }
  0xec   :  { %v2014_v26 = vadd.f32 %v1331_v25, %v1095_v0  ;;  %v214_v27 = vpop.f32.mrb[9].mxu0  ;;  %1681 = vmatprep.subr.bf16.mxu1 %v1680_v63  ;;  %v1112_v25 = vld [vmem:[%s2290_s4] ss:$0 sm:$0xff] }
  0xed   :  { %v2016_v28 = vadd.f32 %v1095_v0, %v214_v27  ;;  %1382 = vmatprep.mubr.f32.mxu1 %v259_v24 }
  0xee   :  { %v262_v29 = vmax.f32 %v2014_v26, 0.0  ;;  %1383 = vmatmul.mubr.f32.gmra.mrb[6].mxu1 %v260_v23 }
  0xef   :  { %v261_v30 = vmax.f32 %v2016_v28, 0.0  ;;  %v1334_v31 = vpop.f32.mrb[10].mxu0  ;;  %1683 = vmatpush3.bf16.msra.mxu1 %v1680_v63 }
  0xf0   :  { %v2024_v32 = vadd.f32 %v1334_v31, %v1095_v0  ;;  %v224_v33 = vpop.f32.mrb[11].mxu0 }
  0xf1   :  { %v2026_v34 = vadd.f32 %v1095_v0, %v224_v33  ;;  %1385 = vmatprep.mubr.f32.mxu1 %v261_v30 }
  0xf2   :  { %v264_v35 = vmax.f32 %v2024_v32, 0.0  ;;  %1386 = vmatmul.mubr.f32.gmra.mrb[8].mxu1 %v262_v29 }
  0xf3   :  { %v263_v36 = vmax.f32 %v2026_v34, 0.0  ;;  %v1337_v37 = vpop.f32.mrb[12].mxu0 }
  0xf4   :  { %v2034_v38 = vadd.f32 %v1337_v37, %v1095_v0  ;;  %v234_v39 = vpop.f32.mrb[13].mxu0 }
  0xf5   :  { %v2036_v40 = vadd.f32 %v1095_v0, %v234_v39  ;;  %1388 = vmatprep.mubr.f32.mxu1 %v263_v36 }
  0xf6   :  { %v266_v41 = vmax.f32 %v2034_v38, 0.0  ;;  %1389 = vmatmul.mubr.f32.gmra.mrb[10].mxu1 %v264_v35  ;;  %v1145_v38 = vld [vmem:[%s2288_s5 + $0xf0] sm:$0xff] }
  0xf7   :  { %v265_v42 = vmax.f32 %v2036_v40, 0.0  ;;  %v1340_v43 = vpop.f32.mrb[14].mxu0 }
  0xf8   :  { %v2044_v44 = vadd.f32 %v1340_v43, %v1095_v0  ;;  %v244_v45 = vpop.f32.mrb[15].mxu0 }
  0xf9   :  { %v2046_v46 = vadd.f32 %v1095_v0, %v244_v45  ;;  %1391 = vmatprep.mubr.f32.mxu1 %v265_v42  ;;  %v1122_v0 = vld [vmem:[%s2287_s3 + $0xc0] sm:$0xff] }
  0xfa   :  { %v268_v47 = vmax.f32 %v2044_v44, 0.0  ;;  %1392 = vmatmul.mubr.f32.gmra.mrb[12].mxu1 %v266_v41  ;;  %v1684_v3 = vpack.c.bf16 %v1123_v1, %v1122_v0  ;;  %v1148_v44 = vld [vmem:[%s2290_s4 + $0x1] ss:$0 sm:$0xff] }
  0xfb   :  { %v267_v48 = vmax.f32 %v2046_v46, 0.0 }
  0xfc   :  { %1685 = vmatprep.subr.bf16.mxu1 %v1684_v3 }
  0xfd   :  { %1394 = vmatprep.mubr.f32.mxu1 %v267_v48  ;;  %1687 = vmatpush3.bf16.msra.mxu1 %v1684_v3 }
  0xfe   :  { %1395 = vmatmul.mubr.f32.gmra.mrb[14].mxu1 %v268_v47  ;;  %1689 = vmatprep.subr.bf16.mxu1 %v1688_v13 }
 0x101   :  { %1691 = vmatpush3.bf16.msra.mxu1 %v1688_v13 }
 0x102   :  { %1693 = vmatprep.subr.bf16.mxu1 %v1692_v21 }
 0x105   :  { %1695 = vmatpush3.bf16.msra.mxu1 %v1692_v21 }
 0x1b5   :  { %v1375_v27 = vpop.f32.mrb[0].mxu1 }
 0x1b6   :  { %v381_v31 = vadd.f32 %v1375_v27, %v1112_v25  ;;  %v375_v33 = vpop.f32.mrb[1].mxu1 }
 0x1b7   :  { %v376_v37 = vadd.f32 %v1112_v25, %v375_v33 }
 0x1b8   :  { %v455_v45 = vmax.f32 %v381_v31, 0.0 }
 0x1b9   :  { %v454_v39 = vmax.f32 %v376_v37, 0.0  ;;  %v1378_v43 = vpop.f32.mrb[2].mxu1 }
 0x1ba   :  { %v391_v49 = vadd.f32 %v1378_v43, %v1112_v25  ;;  %v385_v50 = vpop.f32.mrb[3].mxu1 }
 0x1bb   :  { %v386_v51 = vadd.f32 %v1112_v25, %v385_v50  ;;  %1429 = vmatprep.mubr.f32.mxu0 %v454_v39 }
 0x1bc   :  { %v457_v52 = vmax.f32 %v391_v49, 0.0  ;;  %1430 = vmatmul.mubr.f32.vlgmr.msra.gmra.mrb[16].mxu0 %v455_v45 }
 0x1bd   :  { %v456_v53 = vmax.f32 %v386_v51, 0.0  ;;  %v1381_v54 = vpop.f32.mrb[4].mxu1 }
 0x1be   :  { %v401_v55 = vadd.f32 %v1381_v54, %v1112_v25  ;;  %v395_v56 = vpop.f32.mrb[5].mxu1 }
 0x1bf   :  { %v396_v57 = vadd.f32 %v1112_v25, %v395_v56  ;;  %1432 = vmatprep.mubr.f32.mxu0 %v456_v53 }
 0x1c0   :  { %v459_v58 = vmax.f32 %v401_v55, 0.0  ;;  %1433 = vmatmul.mubr.f32.gmra.mrb[18].mxu0 %v457_v52 }
 0x1c1   :  { %v458_v59 = vmax.f32 %v396_v57, 0.0  ;;  %v1384_v60 = vpop.f32.mrb[6].mxu1 }
 0x1c2   :  { %v411_v61 = vadd.f32 %v1384_v60, %v1112_v25  ;;  %v405_v62 = vpop.f32.mrb[7].mxu1  ;;  %v1129_v60 = vld [vmem:[%s2287_s3 + $0xf8] sm:$0xff] }
 0x1c3   :  { %v406_v63 = vadd.f32 %v1112_v25, %v405_v62  ;;  %1435 = vmatprep.mubr.f32.mxu0 %v458_v59  ;;  %v1128_v59 = vld [vmem:[%s2287_s3 + $0xf0] sm:$0xff]  ;;  %v1132_v62 = vld [vmem:[%s2288_s5 + $0x88] sm:$0xff] }
 0x1c4   :  { %v461_v0 = vmax.f32 %v411_v61, 0.0  ;;  %1436 = vmatmul.mubr.f32.gmra.mrb[20].mxu0 %v459_v58  ;;  %v1696_v61 = vpack.c.bf16 %v1129_v60, %v1128_v59 }
 0x1c5   :  { %v460_v1 = vmax.f32 %v406_v63, 0.0  ;;  %v1387_v3 = vpop.f32.mrb[8].mxu1  ;;  %v1133_v63 = vld [vmem:[%s2288_s5 + $0x90] sm:$0xff] }
 0x1c6   :  { %v421_v6 = vadd.f32 %v1387_v3, %v1112_v25  ;;  %v415_v9 = vpop.f32.mrb[9].mxu1  ;;  %1697 = vmatprep.subr.bf16.mxu1 %v1696_v61 }
 0x1c7   :  { %v416_v13 = vadd.f32 %v1112_v25, %v415_v9  ;;  %1438 = vmatprep.mubr.f32.mxu0 %v460_v1  ;;  %1699 = vmatpush3.bf16.msra.mxu1 %v1696_v61  ;;  %v1134_v1 = vld [vmem:[%s2288_s5 + $0x98] sm:$0xff]  ;;  %v1136_v9 = vld [vmem:[%s2288_s5 + $0xa8] sm:$0xff] }
 0x1c8   :  { %v463_v15 = vmax.f32 %v421_v6, 0.0  ;;  %1439 = vmatmul.mubr.f32.gmra.mrb[22].mxu0 %v461_v0  ;;  %v1704_v3 = vpack.c.bf16 %v1134_v1, %v1133_v63  ;;  %v1135_v6 = vld [vmem:[%s2288_s5 + $0xa0] sm:$0xff] }
 0x1c9   :  { %v462_v19 = vmax.f32 %v416_v13, 0.0  ;;  %v1390_v21 = vpop.f32.mrb[10].mxu1  ;;  %v1708_v13 = vpack.c.bf16 %v1136_v9, %v1135_v6 }
 0x1ca   :  { %v431_v27 = vadd.f32 %v1390_v21, %v1112_v25  ;;  %v425_v31 = vpop.f32.mrb[11].mxu1 }
 0x1cb   :  { %v426_v33 = vadd.f32 %v1112_v25, %v425_v31  ;;  %1441 = vmatprep.mubr.f32.mxu0 %v462_v19  ;;  %v1138_v19 = vld [vmem:[%s2288_s5 + $0xb8] sm:$0xff]  ;;  %v1140_v31 = vld [vmem:[%s2288_s5 + $0xc8] sm:$0xff] }
 0x1cc   :  { %v465_v37 = vmax.f32 %v431_v27, 0.0  ;;  %1442 = vmatmul.mubr.f32.gmra.mrb[24].mxu0 %v463_v15  ;;  %v1137_v15 = vld [vmem:[%s2288_s5 + $0xb0] sm:$0xff]  ;;  %v1139_v27 = vld [vmem:[%s2288_s5 + $0xc0] sm:$0xff] }
 0x1cd   :  { %v464_v39 = vmax.f32 %v426_v33, 0.0  ;;  %v1393_v43 = vpop.f32.mrb[12].mxu1  ;;  %v1712_v21 = vpack.c.bf16 %v1138_v19, %v1137_v15  ;;  %v1716_v33 = vpack.c.bf16 %v1140_v31, %v1139_v27 }
 0x1ce   :  { %v441_v45 = vadd.f32 %v1393_v43, %v1112_v25  ;;  %v435_v49 = vpop.f32.mrb[13].mxu1 }
 0x1cf   :  { %v436_v50 = vadd.f32 %v1112_v25, %v435_v49  ;;  %1444 = vmatprep.mubr.f32.mxu0 %v464_v39  ;;  %v1142_v39 = vld [vmem:[%s2288_s5 + $0xd8] sm:$0xff]  ;;  %v1144_v49 = vld [vmem:[%s2288_s5 + $0xe8] sm:$0xff] }
 0x1d0   :  { %v467_v51 = vmax.f32 %v441_v45, 0.0  ;;  %1445 = vmatmul.mubr.f32.gmra.mrb[26].mxu0 %v465_v37  ;;  %v1141_v37 = vld [vmem:[%s2288_s5 + $0xd0] sm:$0xff]  ;;  %v1143_v45 = vld [vmem:[%s2288_s5 + $0xe0] sm:$0xff] }
 0x1d1   :  { %v466_v52 = vmax.f32 %v436_v50, 0.0  ;;  %v1396_v53 = vpop.f32.mrb[14].mxu1  ;;  %v1720_v43 = vpack.c.bf16 %v1142_v39, %v1141_v37  ;;  %v1724_v50 = vpack.c.bf16 %v1144_v49, %v1143_v45 }
 0x1d2   :  { %v451_v54 = vadd.f32 %v1396_v53, %v1112_v25  ;;  %v445_v55 = vpop.f32.mrb[15].mxu1 }
 0x1d3   :  { %v446_v56 = vadd.f32 %v1112_v25, %v445_v55  ;;  %1447 = vmatprep.mubr.f32.mxu0 %v466_v52  ;;  %v1131_v25 = vld [vmem:[%s2288_s5 + $0x80] sm:$0xff] }
 0x1d4   :  { %v469_v57 = vmax.f32 %v451_v54, 0.0  ;;  %1448 = vmatmul.mubr.f32.gmra.mrb[28].mxu0 %v467_v51  ;;  %v1700_v0 = vpack.c.bf16 %v1132_v62, %v1131_v25  ;;  %v1113_v51 = vld [vmem:[%s2291_s6] ss:$0 sm:$0xff] }
 0x1d5   :  { %v468_v58 = vmax.f32 %v446_v56, 0.0 }
 0x1d6   :  { %1701 = vmatprep.subr.bf16.mxu0 %v1700_v0 }
 0x1d7   :  { %1450 = vmatprep.mubr.f32.mxu0 %v468_v58  ;;  %1703 = vmatpush3.bf16.msra.mxu0 %v1700_v0 }
 0x1d8   :  { %1451 = vmatmul.mubr.f32.gmra.mrb[30].mxu0 %v469_v57  ;;  %1705 = vmatprep.subr.bf16.mxu0 %v1704_v3 }
 0x1db   :  { %1707 = vmatpush3.bf16.msra.mxu0 %v1704_v3 }
 0x1dc   :  { %1709 = vmatprep.subr.bf16.mxu0 %v1708_v13 }
 0x1df   :  { %1711 = vmatpush3.bf16.msra.mxu0 %v1708_v13 }
 0x1e0   :  { %1713 = vmatprep.subr.bf16.mxu0 %v1712_v21 }
 0x1e3   :  { %1715 = vmatpush3.bf16.msra.mxu0 %v1712_v21 }
 0x1e4   :  { %1717 = vmatprep.subr.bf16.mxu0 %v1716_v33 }
 0x1e7   :  { %1719 = vmatpush3.bf16.msra.mxu0 %v1716_v33 }
 0x1e8   :  { %1721 = vmatprep.subr.bf16.mxu0 %v1720_v43 }
 0x1eb   :  { %1723 = vmatpush3.bf16.msra.mxu0 %v1720_v43 }
 0x1ec   :  { %1725 = vmatprep.subr.bf16.mxu0 %v1724_v50 }
 0x1ef   :  { %1727 = vmatpush3.bf16.msra.mxu0 %v1724_v50 }
 0x28f   :  { %v1431_v52 = vpop.f32.mrb[16].mxu0 }
 0x290   :  { %v548_v53 = vadd.f32 %v1431_v52, %v1113_v51  ;;  %v542_v54 = vpop.f32.mrb[17].mxu0 }
 0x291   :  { %v543_v55 = vadd.f32 %v1113_v51, %v542_v54 }
 0x292   :  { %v2166_v58 = vadd.f32 %v548_v53, %v254_v7 }
 0x293   :  { %v2162_v56 = vadd.f32 %v543_v55, %v253_v5  ;;  %v1434_v57 = vpop.f32.mrb[18].mxu0 }
 0x294   :  { %v558_v59 = vadd.f32 %v1434_v57, %v1113_v51  ;;  %v552_v60 = vpop.f32.mrb[19].mxu0 }
 0x295   :  { %v553_v61 = vadd.f32 %v1113_v51, %v552_v60  ;;  %1485 = vmatprep.mubr.f32.mxu1 %v2162_v56 }
 0x296   :  { %1486 = vmatmul.mubr.f32.vlgmr.msra.gmra.mrb[16].mxu1 %v2166_v58  ;;  %v2176_v4 = vadd.f32 %v558_v59, %v256_v11 }
 0x297   :  { %v2172_v25 = vadd.f32 %v553_v61, %v255_v12  ;;  %v1437_v62 = vpop.f32.mrb[20].mxu0 }
 0x298   :  { %v568_v5 = vadd.f32 %v1437_v62, %v1113_v51  ;;  %v562_v2 = vpop.f32.mrb[21].mxu0 }
 0x299   :  { %v563_v7 = vadd.f32 %v1113_v51, %v562_v2  ;;  %1488 = vmatprep.mubr.f32.mxu1 %v2172_v25 }
 0x29a   :  { %1489 = vmatmul.mubr.f32.gmra.mrb[18].mxu1 %v2176_v4  ;;  %v2186_v10 = vadd.f32 %v568_v5, %v258_v17 }
 0x29b   :  { %v2182_v63 = vadd.f32 %v563_v7, %v257_v18  ;;  %v1440_v0 = vpop.f32.mrb[22].mxu0 }
 0x29c   :  { %v578_v12 = vadd.f32 %v1440_v0, %v1113_v51  ;;  %v572_v8 = vpop.f32.mrb[23].mxu0 }
 0x29d   :  { %v573_v11 = vadd.f32 %v1113_v51, %v572_v8  ;;  %1491 = vmatprep.mubr.f32.mxu1 %v2182_v63 }
 0x29e   :  { %1492 = vmatmul.mubr.f32.gmra.mrb[20].mxu1 %v2186_v10  ;;  %v2196_v16 = vadd.f32 %v578_v12, %v260_v23 }
 0x29f   :  { %v2192_v1 = vadd.f32 %v573_v11, %v259_v24  ;;  %v1443_v3 = vpop.f32.mrb[24].mxu0 }
 0x2a0   :  { %v588_v18 = vadd.f32 %v1443_v3, %v1113_v51  ;;  %v582_v14 = vpop.f32.mrb[25].mxu0 }
 0x2a1   :  { %v583_v17 = vadd.f32 %v1113_v51, %v582_v14  ;;  %1494 = vmatprep.mubr.f32.mxu1 %v2192_v1 }
 0x2a2   :  { %1495 = vmatmul.mubr.f32.gmra.mrb[22].mxu1 %v2196_v16  ;;  %v2206_v22 = vadd.f32 %v588_v18, %v262_v29 }
 0x2a3   :  { %v2202_v6 = vadd.f32 %v583_v17, %v261_v30  ;;  %v1446_v9 = vpop.f32.mrb[26].mxu0 }
 0x2a4   :  { %v598_v24 = vadd.f32 %v1446_v9, %v1113_v51  ;;  %v592_v20 = vpop.f32.mrb[27].mxu0 }
 0x2a5   :  { %v593_v23 = vadd.f32 %v1113_v51, %v592_v20  ;;  %1497 = vmatprep.mubr.f32.mxu1 %v2202_v6 }
 0x2a6   :  { %1498 = vmatmul.mubr.f32.gmra.mrb[24].mxu1 %v2206_v22  ;;  %v2216_v28 = vadd.f32 %v598_v24, %v264_v35 }
 0x2a7   :  { %v2212_v13 = vadd.f32 %v593_v23, %v263_v36  ;;  %v1449_v15 = vpop.f32.mrb[28].mxu0 }
 0x2a8   :  { %v608_v30 = vadd.f32 %v1449_v15, %v1113_v51  ;;  %v602_v26 = vpop.f32.mrb[29].mxu0 }
 0x2a9   :  { %v603_v29 = vadd.f32 %v1113_v51, %v602_v26  ;;  %1500 = vmatprep.mubr.f32.mxu1 %v2212_v13 }
 0x2aa   :  { %1501 = vmatmul.mubr.f32.gmra.mrb[26].mxu1 %v2216_v28  ;;  %v2226_v34 = vadd.f32 %v608_v30, %v266_v41  ;;  %v1146_v41 = vld [vmem:[%s2288_s5 + $0xf8] sm:$0xff] }
 0x2ab   :  { %v2222_v19 = vadd.f32 %v603_v29, %v265_v42  ;;  %v1452_v21 = vpop.f32.mrb[30].mxu0  ;;  %v1728_v42 = vpack.c.bf16 %v1146_v41, %v1145_v38 }
 0x2ac   :  { %v618_v36 = vadd.f32 %v1452_v21, %v1113_v51  ;;  %v612_v32 = vpop.f32.mrb[31].mxu0 }
 0x2ad   :  { %v613_v35 = vadd.f32 %v1113_v51, %v612_v32  ;;  %1503 = vmatprep.mubr.f32.mxu1 %v2222_v19  ;;  %1729 = vmatprep.subr.bf16.mxu0 %v1728_v42 }
 0x2ae   :  { %1504 = vmatmul.mubr.f32.gmra.mrb[28].mxu1 %v2226_v34  ;;  %v2236_v40 = vadd.f32 %v618_v36, %v268_v47  ;;  %1731 = vmatpush3.bf16.msra.mxu0 %v1728_v42 }
 0x2af   :  { %v2232_v27 = vadd.f32 %v613_v35, %v267_v48 }
 0x2b1   :  { %1506 = vmatprep.mubr.f32.mxu1 %v2232_v27 }
 0x2b2   :  { %1507 = vmatmul.mubr.f32.gmra.mrb[30].mxu1 %v2236_v40 }
 0x369   :  { %v1487_v46 = vpop.f32.mrb[16].mxu1 }
 0x36a   :  { %v753_v47 = vadd.f32 %v1487_v46, %v1148_v44  ;;  %v747_v48 = vpop.f32.mrb[17].mxu1 }
 0x36b   :  { %v748_v31 = vadd.f32 %v1148_v44, %v747_v48  ;;  %v1763_v48 = vmov 0.0  }
 0x36c   :  { %v827_v39 = vmax.f32 %v753_v47, 0.0  ;;  %v1761_v47 = vmov 0.0|0.0   ;;  %1597 = vmatprep.mubr.msk.f32.mxu1 %vm1762_vm1, %v1763_v48 }
 0x36d   :  { %v826_v33 = vmax.f32 %v748_v31, 0.0  ;;  %v1490_v37 = vpop.f32.mrb[18].mxu1  ;;  %1732 = vmatprep.subr.bf16.mxu1 %v1761_v47  ;;  %v1764_v31 = vmov 0  }
 0x36e   :  { %v763_v43 = vadd.f32 %v1490_v37, %v1148_v44  ;;  %v757_v45 = vpop.f32.mrb[19].mxu1  ;;  %1760 = vset.pattern.permute.xlu0 %v1764_v31  ;;  %v1149_v37 = vld [vmem:[%s2291_s6 + $0x1] ss:$0 sm:$0xff] }
 0x36f   :  { %v758_v49 = vadd.f32 %v1148_v44, %v757_v45  ;;  %1541 = vmatprep.mubr.f32.mxu0 %v826_v33  ;;  %v14_v33 = vstv %s2292_s8 }
 0x370   :  { %1542 = vmatmul.mubr.f32.vlgmr.msra.gmra.mrb[32].mxu0 %v827_v39  ;;  %v829_v52 = vmax.f32 %v763_v43, 0.0  ;;  %15 = vst [vmem:[#allocation2] sm:$0x1] %v14_v33 }
 0x371   :  { %v828_v50 = vmax.f32 %v758_v49, 0.0  ;;  %v1493_v51 = vpop.f32.mrb[20].mxu1 }
 0x372   :  { %v773_v53 = vadd.f32 %v1493_v51, %v1148_v44  ;;  %v767_v54 = vpop.f32.mrb[21].mxu1 }
 0x373   :  { %v768_v55 = vadd.f32 %v1148_v44, %v767_v54  ;;  %1544 = vmatprep.mubr.f32.mxu0 %v828_v50 }
 0x374   :  { %1545 = vmatmul.mubr.f32.gmra.mrb[34].mxu0 %v829_v52  ;;  %v831_v60 = vmax.f32 %v773_v53, 0.0 }
 0x375   :  { %v830_v57 = vmax.f32 %v768_v55, 0.0  ;;  %v1496_v59 = vpop.f32.mrb[22].mxu1 }
 0x376   :  { %v783_v61 = vadd.f32 %v1496_v59, %v1148_v44  ;;  %v777_v62 = vpop.f32.mrb[23].mxu1 }
 0x377   :  { %v778_v5 = vadd.f32 %v1148_v44, %v777_v62  ;;  %1547 = vmatprep.mubr.f32.mxu0 %v830_v57 }
 0x378   :  { %1548 = vmatmul.mubr.f32.gmra.mrb[36].mxu0 %v831_v60  ;;  %v833_v0 = vmax.f32 %v783_v61, 0.0 }
 0x379   :  { %v832_v2 = vmax.f32 %v778_v5, 0.0  ;;  %v1499_v7 = vpop.f32.mrb[24].mxu1 }
 0x37a   :  { %v793_v12 = vadd.f32 %v1499_v7, %v1148_v44  ;;  %v787_v8 = vpop.f32.mrb[25].mxu1 }
 0x37b   :  { %v788_v11 = vadd.f32 %v1148_v44, %v787_v8  ;;  %1550 = vmatprep.mubr.f32.mxu0 %v832_v2 }
 0x37c   :  { %1551 = vmatmul.mubr.f32.gmra.mrb[38].mxu0 %v833_v0  ;;  %v835_v14 = vmax.f32 %v793_v12, 0.0 }
 0x37d   :  { %v834_v3 = vmax.f32 %v788_v11, 0.0  ;;  %v1502_v18 = vpop.f32.mrb[26].mxu1 }
 0x37e   :  { %v803_v17 = vadd.f32 %v1502_v18, %v1148_v44  ;;  %v797_v9 = vpop.f32.mrb[27].mxu1 }
 0x37f   :  { %v798_v24 = vadd.f32 %v1148_v44, %v797_v9  ;;  %1553 = vmatprep.mubr.f32.mxu0 %v834_v3 }
 0x380   :  { %1554 = vmatmul.mubr.f32.gmra.mrb[40].mxu0 %v835_v14  ;;  %v837_v15 = vmax.f32 %v803_v17, 0.0 }
 0x381   :  { %v836_v20 = vmax.f32 %v798_v24, 0.0  ;;  %v1505_v23 = vpop.f32.mrb[28].mxu1 }
 0x382   :  { %v813_v30 = vadd.f32 %v1505_v23, %v1148_v44  ;;  %v807_v26 = vpop.f32.mrb[29].mxu1 }
 0x383   :  { %v808_v29 = vadd.f32 %v1148_v44, %v807_v26  ;;  %1556 = vmatprep.mubr.f32.mxu0 %v836_v20 }
 0x384   :  { %1557 = vmatmul.mubr.f32.gmra.mrb[42].mxu0 %v837_v15  ;;  %v839_v32 = vmax.f32 %v813_v30, 0.0 }
 0x385   :  { %v838_v21 = vmax.f32 %v808_v29, 0.0  ;;  %v1508_v36 = vpop.f32.mrb[30].mxu1 }
 0x386   :  { %v823_v35 = vadd.f32 %v1508_v36, %v1148_v44  ;;  %v817_v38 = vpop.f32.mrb[31].mxu1 }
 0x387   :  { %v818_v41 = vadd.f32 %v1148_v44, %v817_v38  ;;  %1559 = vmatprep.mubr.f32.mxu0 %v838_v21  ;;  %v1010_v44 = vld [vmem:[#allocation2] sm:$0x1] }
 0x388   :  { %1560 = vmatmul.mubr.f32.gmra.mrb[44].mxu0 %v839_v32  ;;  %v841_v46 = vmax.f32 %v823_v35, 0.0  ;;  %1013 = vperm.xlu0 %1760, %v1010_v44  }
 0x389   :  { %v840_v42 = vmax.f32 %v818_v41, 0.0 }
 0x38b   :  { %1562 = vmatprep.mubr.f32.mxu0 %v840_v42 }
 0x38c   :  { %1563 = vmatmul.mubr.f32.gmra.mrb[46].mxu0 %v841_v46 }
 0x407   :  { %v1014_v33 = vpop.permute.xlu0 %1013 }
 0x443   :  { %v1543_v39 = vpop.f32.mrb[32].mxu0 }
 0x444   :  { %v920_v43 = vadd.f32 %v1543_v39, %v1149_v37  ;;  %v914_v45 = vpop.f32.mrb[33].mxu0 }
 0x445   :  { %v915_v49 = vadd.f32 %v1149_v37, %v914_v45 }
 0x446   :  { %v994_v50 = vadd.f32 %v920_v43, %v2166_v58 }
 0x447   :  { %v993_v51 = vadd.f32 %v915_v49, %v2162_v56  ;;  %v1546_v52 = vpop.f32.mrb[34].mxu0 }
 0x448   :  { %v930_v53 = vadd.f32 %v1546_v52, %v1149_v37  ;;  %v924_v54 = vpop.f32.mrb[35].mxu0 }
 0x449   :  { %v1733_v55 = vpack.c.bf16 %v994_v50, %v993_v51  ;;  %v925_v57 = vadd.f32 %v1149_v37, %v924_v54 }
 0x44a   :  { %v996_v59 = vadd.f32 %v930_v53, %v2176_v4 }
 0x44b   :  { %v995_v60 = vadd.f32 %v925_v57, %v2172_v25  ;;  %v1549_v61 = vpop.f32.mrb[36].mxu0  ;;  %1734 = vmatpush3.bf16.xpose.msra.mxu1 %v1733_v55 }
 0x44c   :  { %v940_v62 = vadd.f32 %v1549_v61, %v1149_v37  ;;  %v934_v5 = vpop.f32.mrb[37].mxu0  ;;  %1735 = vmatprep.subr.bf16.mxu1 %v1761_v47 }
 0x44d   :  { %v1736_v2 = vpack.c.bf16 %v996_v59, %v995_v60  ;;  %v935_v7 = vadd.f32 %v1149_v37, %v934_v5 }
 0x44e   :  { %v998_v58 = vadd.f32 %v940_v62, %v2186_v10 }
 0x44f   :  { %v997_v56 = vadd.f32 %v935_v7, %v2182_v63  ;;  %v1552_v0 = vpop.f32.mrb[38].mxu0 }
 0x450   :  { %v950_v12 = vadd.f32 %v1552_v0, %v1149_v37  ;;  %v944_v8 = vpop.f32.mrb[39].mxu0 }
 0x451   :  { %v1739_v11 = vpack.c.bf16 %v998_v58, %v997_v56  ;;  %v945_v3 = vadd.f32 %v1149_v37, %v944_v8 }
 0x452   :  { %v1000_v4 = vadd.f32 %v950_v12, %v2196_v16 }
 0x453   :  { %v999_v25 = vadd.f32 %v945_v3, %v2192_v1  ;;  %v1555_v18 = vpop.f32.mrb[40].mxu0  ;;  %1737 = vmatpush3.bf16.xpose.msra.mxu1 %v1736_v2 }
 0x454   :  { %v960_v14 = vadd.f32 %v1555_v18, %v1149_v37  ;;  %v954_v17 = vpop.f32.mrb[41].mxu0  ;;  %1738 = vmatprep.subr.bf16.mxu1 %v1761_v47 }
 0x455   :  { %v1742_v9 = vpack.c.bf16 %v1000_v4, %v999_v25  ;;  %v955_v24 = vadd.f32 %v1149_v37, %v954_v17 }
 0x456   :  { %v1002_v10 = vadd.f32 %v960_v14, %v2206_v22 }
 0x457   :  { %v1001_v63 = vadd.f32 %v955_v24, %v2202_v6  ;;  %v1558_v20 = vpop.f32.mrb[42].mxu0 }
 0x458   :  { %v970_v23 = vadd.f32 %v1558_v20, %v1149_v37  ;;  %v964_v15 = vpop.f32.mrb[43].mxu0 }
 0x459   :  { %v1745_v30 = vpack.c.bf16 %v1002_v10, %v1001_v63  ;;  %v965_v26 = vadd.f32 %v1149_v37, %v964_v15 }
 0x45a   :  { %v1004_v16 = vadd.f32 %v970_v23, %v2216_v28 }
 0x45b   :  { %v1003_v1 = vadd.f32 %v965_v26, %v2212_v13  ;;  %v1561_v29 = vpop.f32.mrb[44].mxu0  ;;  %1740 = vmatpush3.bf16.xpose.msra.mxu1 %v1739_v11 }
 0x45c   :  { %v980_v21 = vadd.f32 %v1561_v29, %v1149_v37  ;;  %v974_v36 = vpop.f32.mrb[45].mxu0  ;;  %1741 = vmatprep.subr.bf16.mxu1 %v1761_v47 }
 0x45d   :  { %v1748_v32 = vpack.c.bf16 %v1004_v16, %v1003_v1  ;;  %v975_v35 = vadd.f32 %v1149_v37, %v974_v36 }
 0x45e   :  { %v1006_v22 = vadd.f32 %v980_v21, %v2226_v34  ;;  %v1016_v34 = vlaneseq }
 0x45f   :  { %v1005_v6 = vadd.f32 %v975_v35, %v2222_v19  ;;  %v1564_v38 = vpop.f32.mrb[46].mxu0  ;;  %v1009_v19 = vld [vmem:[%s2293_s7] sm:$0x1] }
 0x460   :  { %v990_v41 = vadd.f32 %v1564_v38, %v1149_v37  ;;  %v984_v42 = vpop.f32.mrb[47].mxu0 }
 0x461   :  { %v1751_v46 = vpack.c.bf16 %v1006_v22, %v1005_v6  ;;  %v985_v48 = vadd.f32 %v1149_v37, %v984_v42 }
 0x462   :  { %v1008_v28 = vadd.f32 %v990_v41, %v2236_v40 }
 0x463   :  { %v1007_v13 = vadd.f32 %v985_v48, %v2232_v27  ;;  %1743 = vmatpush3.bf16.xpose.msra.mxu1 %v1742_v9  ;;  %v1017_v27 = vshrl.u32 %v1016_v34, 7 }
 0x464   :  { %1744 = vmatprep.subr.bf16.mxu1 %v1761_v47 }
 0x465   :  { %v1754_v31 = vpack.c.bf16 %v1008_v28, %v1007_v13  ;;  %v1018_v40 = vsub.s32 0, %v1017_v27 }
 0x467   :  { %v1019_v44 = vrot.slane %v1014_v33, %v1018_v40 }
 0x46b   :  { %1746 = vmatpush3.bf16.xpose.msra.mxu1 %v1745_v30 }
 0x46c   :  { %1747 = vmatprep.subr.bf16.mxu1 %v1761_v47 }
 0x473   :  { %1749 = vmatpush3.bf16.xpose.msra.mxu1 %v1748_v32 }
 0x474   :  { %1750 = vmatprep.subr.bf16.mxu1 %v1761_v47 }
 0x47b   :  { %1752 = vmatpush3.bf16.xpose.msra.mxu1 %v1751_v46 }
 0x47c   :  { %1753 = vmatprep.subr.bf16.mxu1 %v1761_v47 }
 0x483   :  { %1755 = vmatpush3.bf16.xpose.msra.mxu1 %v1754_v31 }
 0x48a   :  { %1598 = vmatmul.mubr.f32.vlgmr.msra.gmra.mrb[32].mxu1 %v1009_v19 }
 0x55d   :  { %v1086_v37 = vpop.f32.mrb[32].mxu1 }
 0x55e   :  { %v1087_v39 = vadd.f32 %v1086_v37, %v1019_v44  ;;  %v1599_v43 = vpop.f32.mrb[33].mxu1 }
 0x560   :  { %1090 = vst [vmem:[%s2294_s9] sm:$0x1] %v1087_v39 }

</bundles_post_ra>
